<compile_context>
chip_gen: v7x
topology: tpu7x:2x2x1
jax: 0.10.0
libtpu: 0.0.40
codegen_flags: <defaults>
</compile_context>

<pallas_src>
import functools

import jax
import jax.numpy as jnp
from jax.experimental import pallas as pl
from jax.experimental.pallas import tpu as pltpu


_NO_DROPOUT = 0     # fc -> sigmoid
_DROPOUT_HW = 1     # in-kernel TPU PRNG mask (seed scalar in SMEM)
_DROPOUT_HOST = 2   # wrapper-supplied uniforms (non-TPU / interpret fallback)


def _shallow_ann_kernel(*refs, drop_prob, mode):
    """One batch tile of ShallowANN: o = sigmoid(dropout(x @ w.T + b)).

    Ref layout (inputs..., output):
      mode == _NO_DROPOUT  : x_ref, w_ref, b_ref, o_ref
      mode == _DROPOUT_HW  : x_ref, w_ref, b_ref, seed_ref, o_ref
      mode == _DROPOUT_HOST: x_ref, w_ref, b_ref, u_ref,    o_ref

    x_ref : (TB, F)  samples on sublanes, features on lanes
    w_ref : (1, F)   nn.Linear weight (out_features=1), same dtype as x
    b_ref : (1, 1)   f32 bias (SMEM scalar)
    o_ref : (1, TB)  f32 lane-dense outputs for this batch tile
    """
    if mode == _NO_DROPOUT:
        x_ref, w_ref, b_ref, o_ref = refs
    elif mode == _DROPOUT_HW:
        x_ref, w_ref, b_ref, seed_ref, o_ref = refs
    else:
        x_ref, w_ref, b_ref, u_ref, o_ref = refs

    # y[0, j] = sum_f w[0, f] * x[j, f]: contracting the LAST dims with w as
    # LHS needs no transpose and lands directly in the lane-dense (1, TB)
    # layout of the output block.  Accumulation is f32.
    y = jax.lax.dot_general(
        w_ref[...],
        x_ref[...],
        dimension_numbers=(((1,), (1,)), ((), ())),
        preferred_element_type=jnp.float32,
    )
    y = y + b_ref[0, 0]

    if mode != _NO_DROPOUT:
        if mode == _DROPOUT_HW:
            # Hardware PRNG: no HBM bytes spent on the dropout draws.
            pltpu.prng_seed(seed_ref[0] + pl.program_id(0))
            bits = pltpu.bitcast(pltpu.prng_random_bits(y.shape), jnp.uint32)
            # 23 random mantissa bits -> float in [1, 2) -> uniform [0, 1).
            fbits = pltpu.bitcast(
                jnp.bitwise_or(jnp.right_shift(bits, 9),
                               jnp.uint32(0x3F800000)),
                jnp.float32)
            u = fbits - 1.0
        else:
            u = u_ref[...]
        # Inverted dropout on the linear output (forward: fc -> drop -> sig):
        # P(keep) = 1 - p, kept values rescaled by 1/(1-p).
        keep = u >= jnp.float32(drop_prob)
        y = jnp.where(keep, y * (1.0 / (1.0 - drop_prob)), 0.0)

    # Sigmoid: exp and the approximate reciprocal both run on the EUP slot.
    o_ref[...] = pl.reciprocal(1.0 + jnp.exp(-y), approx=True).astype(o_ref.dtype)


def _round_up(n, m):
    return ((n + m - 1) // m) * m


def _pick_tile(B, F, itemsize, block_rows):
    """Pick the batch-tile size TB (multiple of 128).

    Big enough to amortise the ~0.35us per-grid-step overhead, small enough
    that the double-buffered x tile stays inside a per-generation VMEM budget
    (v5e/v6e: 128 MiB physical; v7x: only 64 MiB).  The (TB, F) tile pads its
    last dim to 128 lanes inside VMEM, which the budget accounts for.
    """
    try:
        kind = jax.devices()[0].device_kind.lower()
    except Exception:
        kind = ""
    is_v7 = "v7" in kind
    if block_rows is None:
        block_rows = 16384 if is_v7 else 32768
    lane_bytes = _round_up(F, 128) * itemsize          # bytes per row in VMEM
    budget = (24 << 20) if is_v7 else (48 << 20)       # for the 2x double buffer
    tb_vmem_cap = max(128, (budget // (2 * lane_bytes)) // 128 * 128)
    return min(_round_up(block_rows, 128), _round_up(B, 128), tb_vmem_cap)


def shallow_ann(x, w, b, drop_prob, key=None, *, block_rows=None):
    """Fused ShallowANN forward.

    x: (B, F) f32 or bf16; w: (1, F) (PyTorch nn.Linear weight layout);
    b: bias (scalar / (1,) / (1,1)); drop_prob: python float in [0, 1);
    key: jax PRNG key, required when drop_prob > 0.  Returns (B, 1) f32.
    """
    drop_prob = float(drop_prob)
    assert 0.0 <= drop_prob < 1.0, "drop_prob must be in [0, 1)"

    x = jnp.asarray(x)
    if x.dtype not in (jnp.float32, jnp.bfloat16):
        x = x.astype(jnp.float32)
    w = jnp.asarray(w).reshape(1, -1).astype(x.dtype)
    b = jnp.asarray(b, jnp.float32).reshape(1, 1)
    B, F = x.shape

    TB = _pick_tile(B, F, x.dtype.itemsize, block_rows)
    G_full, rem = divmod(B, TB)

    on_tpu = jax.default_backend() == "tpu"
    if drop_prob > 0.0:
        if key is None:
            raise ValueError("key is required when drop_prob > 0")
        mode = _DROPOUT_HW if on_tpu else _DROPOUT_HOST
    else:
        mode = _NO_DROPOUT

    kernel = functools.partial(_shallow_ann_kernel, drop_prob=drop_prob, mode=mode)
    lane_bytes = _round_up(F, 128) * x.dtype.itemsize
    vmem_limit = int(min(max(2 * TB * lane_bytes + (8 << 20), 32 << 20), 100 << 20))

    def _run(x_part, n_tiles, extra):
        in_specs = [
            pl.BlockSpec((TB, F), lambda i: (i, 0)),              # x tile
            pl.BlockSpec((1, F), lambda i: (0, 0)),               # weight
            pl.BlockSpec(memory_space=pltpu.MemorySpace.SMEM),    # bias scalar
        ]
        args = [x_part, w, b]
        if mode == _DROPOUT_HW:
            in_specs.append(pl.BlockSpec(memory_space=pltpu.MemorySpace.SMEM))
            args.append(extra)                                    # (1,) i32 seed
        elif mode == _DROPOUT_HOST:
            in_specs.append(pl.BlockSpec((1, TB), lambda i: (i, 0)))
            args.append(extra)                                    # (n_tiles, TB) uniforms
        return pl.pallas_call(
            kernel,
            out_shape=jax.ShapeDtypeStruct((n_tiles, TB), jnp.float32),
            grid=(n_tiles,),
            in_specs=in_specs,
            out_specs=pl.BlockSpec((1, TB), lambda i: (i, 0)),
            compiler_params=pltpu.CompilerParams(
                dimension_semantics=("parallel",),   # shards tiles over both TCs on v7x
                vmem_limit_bytes=vmem_limit,
            ),
        )(*args)

    # Dropout side inputs (none on the inference path).
    if mode == _DROPOUT_HW:
        seed = jax.random.randint(key, (1,), 0, jnp.iinfo(jnp.int32).max,
                                  dtype=jnp.int32)
        extra_main = seed
        extra_tail = seed + jnp.int32(G_full)   # distinct stream for the tail tile
    elif mode == _DROPOUT_HOST:
        k_main, k_tail = jax.random.split(key)
        extra_main = jax.random.uniform(k_main, (max(G_full, 1), TB), dtype=jnp.float32)
        extra_tail = jax.random.uniform(k_tail, (1, TB), dtype=jnp.float32)
    else:
        extra_main = extra_tail = None

    pieces = []
    if G_full > 0:
        # Pass the FULL x: the grid only touches the first G_full*TB rows, so
        # no wrapper-side copy/pad of the big tensor is ever materialized.
        out_main = _run(x, G_full, extra_main)
        pieces.append(out_main.reshape(G_full * TB, 1))
    if rem > 0:
        # Pad only the tail tile (rem < TB rows) -> cheap, O(TB*F) bytes.
        x_tail = jnp.pad(jax.lax.slice_in_dim(x, G_full * TB, B, axis=0),
                         ((0, TB - rem), (0, 0)))
        out_tail = _run(x_tail, 1, extra_tail)
        pieces.append(out_tail.reshape(TB, 1)[:rem])
    return pieces[0] if len(pieces) == 1 else jnp.concatenate(pieces, axis=0)


if __name__ == "__main__":
    key = jax.random.PRNGKey(0)
    kx, kw, kb, kdrop, kx2 = jax.random.split(key, 5)

    B, F = 256, 32  # small batch, n_features = 32
    x = jax.random.normal(kx, (B, F), dtype=jnp.float32)
    bound = 1.0 / (F ** 0.5)  # mimic nn.Linear's U(-1/sqrt(F), 1/sqrt(F)) init
    w = jax.random.uniform(kw, (1, F), minval=-bound, maxval=bound, dtype=jnp.float32)
    b = jax.random.uniform(kb, (1, 1), minval=-bound, maxval=bound, dtype=jnp.float32)

    # Exact-f32 elementwise reference of the linear output.
    z = jnp.sum(x * w, axis=-1, keepdims=True) + b[0, 0]

    # 1) No dropout (inference path): must match sigmoid(z).
    out0 = shallow_ann(x, w, b, drop_prob=0.0)
    jax.block_until_ready(out0)
    assert out0.shape == (B, 1) and out0.dtype == jnp.float32
    ref0 = 1.0 / (1.0 + jnp.exp(-z))
    assert bool(jnp.allclose(out0, ref0, atol=5e-3, rtol=5e-3)), "no-dropout mismatch"

    # 2) MC dropout active: every output is either sigmoid(0)=0.5 (dropped) or
    #    sigmoid(z/(1-p)) (kept & rescaled), and the mask is non-degenerate.
    p = 0.25
    out1 = shallow_ann(x, w, b, drop_prob=p, key=kdrop)
    jax.block_until_ready(out1)
    assert out1.shape == (B, 1) and out1.dtype == jnp.float32
    kept = 1.0 / (1.0 + jnp.exp(-z / (1.0 - p)))
    is_drop = jnp.abs(out1 - 0.5) < 1e-3
    ok = is_drop | (jnp.abs(out1 - kept) < 5e-3)
    assert bool(jnp.all(ok)), "dropout outputs not in {dropped, kept} set"
    n_drop = int(jnp.sum(is_drop))
    assert 0 < n_drop < B, "dropout mask is degenerate"

    # 3) Multi-tile + tail path (B not a multiple of the batch tile).
    B2 = 300
    x2 = jax.random.normal(kx2, (B2, F), dtype=jnp.float32)
    z2 = jnp.sum(x2 * w, axis=-1, keepdims=True) + b[0, 0]
    out2 = shallow_ann(x2, w, b, drop_prob=0.0, block_rows=128)
    jax.block_until_ready(out2)
    assert out2.shape == (B2, 1)
    ref2 = 1.0 / (1.0 + jnp.exp(-z2))
    assert bool(jnp.allclose(out2, ref2, atol=5e-3, rtol=5e-3)), "tiled/tail mismatch"

    print("KERNEL_OK")
</pallas_src>

<mosaic_0001>
module attributes {stable_mosaic.version = 11 : i64} {
  func.func @_shallow_ann_kernel(%arg0: i32, %arg1: memref<256x32xf32, #tpu.memory_space<vmem>>, %arg2: memref<1x32xf32, #tpu.memory_space<vmem>>, %arg3: memref<1x1xf32, #tpu.memory_space<smem>>, %arg4: memref<1x256xf32, #tpu.memory_space<vmem>>) attributes {dimension_semantics = [#tpu.dimension_semantics<parallel>], iteration_bounds = array<i64: 1>, scalar_prefetch = 0 : i64, scratch_operands = 0 : i64, tpu.core_type = #tpu.core_type<tc>, window_params = [{transform_indices = @transform_0, window_bounds = array<i64: 256, 32>}, {pipeline_mode = #tpu.pipeline_mode<synchronous>, transform_indices = @transform_1, window_bounds = array<i64: 1, 32>}, {transform_indices = @transform_2, window_bounds = array<i64: 1, 1>}, {transform_indices = @transform_3, window_bounds = array<i64: 1, 256>}]} {
    %c0 = arith.constant 0 : index
    %c0_0 = arith.constant 0 : index
    %0 = vector.load %arg2[%c0, %c0_0] : memref<1x32xf32, #tpu.memory_space<vmem>>, vector<1x32xf32>
    %c0_1 = arith.constant 0 : index
    %c0_2 = arith.constant 0 : index
    %1 = vector.load %arg1[%c0_1, %c0_2] : memref<256x32xf32, #tpu.memory_space<vmem>>, vector<256x32xf32>
    %cst = arith.constant dense<0.000000e+00> : vector<1x256xf32>
    %2 = tpu.matmul %0, %1, %cst {dimension_numbers = #tpu.dot_dimension_numbers<[1], [1], [0], [0], [0, 0, 1, 0], [], []>} : vector<1x32xf32>, vector<256x32xf32>, vector<1x256xf32> -> vector<1x256xf32>
    %c0_3 = arith.constant 0 : index
    %c0_4 = arith.constant 0 : index
    %3 = memref.load %arg3[%c0_3, %c0_4] : memref<1x1xf32, #tpu.memory_space<smem>>
    %4 = vector.broadcast %3 : f32 to vector<1x256xf32>
    %5 = arith.addf %2, %4 : vector<1x256xf32>
    %cst_5 = arith.constant 0.000000e+00 : f32
    %6 = vector.broadcast %cst_5 : f32 to vector<1x256xf32>
    %7 = arith.subf %6, %5 : vector<1x256xf32>
    %8 = math.exp %7 : vector<1x256xf32>
    %cst_6 = arith.constant 1.000000e+00 : f32
    %9 = vector.broadcast %cst_6 : f32 to vector<1x256xf32>
    %10 = arith.addf %9, %8 : vector<1x256xf32>
    %11 = tpu.reciprocal %10 {approx = true} : vector<1x256xf32> -> vector<1x256xf32>
    %c0_7 = arith.constant 0 : index
    %c0_8 = arith.constant 0 : index
    %12 = vector.load %arg4[%c0_7, %c0_8] : memref<1x256xf32, #tpu.memory_space<vmem>>, vector<1x256xf32>
    tpu.vector_store %arg4[%c0_7, %c0_8], %11 {strides = array<i32>} : memref<1x256xf32, #tpu.memory_space<vmem>>, vector<1x256xf32>,
    return
  }
  func.func @transform_0(%arg0: i32) -> (i32, i32) {
    %c0_i32 = arith.constant 0 : i32
    %c0_i32_0 = arith.constant 0 : i32
    return %arg0, %c0_i32 : i32, i32
  }
  func.func @transform_1(%arg0: i32) -> (i32, i32) {
    %c0_i32 = arith.constant 0 : i32
    %c0_i32_0 = arith.constant 0 : i32
    %c0_i32_1 = arith.constant 0 : i32
    return %c0_i32, %c0_i32_0 : i32, i32
  }
  func.func @transform_2(%arg0: i32) -> (i32, i32) {
    %c0_i32 = arith.constant 0 : i32
    %c0_i32_0 = arith.constant 0 : i32
    %c0_i32_1 = arith.constant 0 : i32
    return %c0_i32, %c0_i32_0 : i32, i32
  }
  func.func @transform_3(%arg0: i32) -> (i32, i32) {
    %c0_i32 = arith.constant 0 : i32
    %c0_i32_0 = arith.constant 0 : i32
    return %arg0, %c0_i32 : i32, i32
  }
}

</mosaic_0001>

<bundles_post_ra>
// kernel: tpu_custom_call.1
= control target key start
LH: loop header
LB: loop body
LE: loop exit
PB: predicated region body
PF: predicated region fallthrough
CT: control target
= control target key end

     0   :  { %vm51_vm0 = vcmask 261120   ;;  %s594_s0 = inlined_call_operand.vmem [shape: f32[256,32], index: 0, kind: input, shape index: {}]   ;;  %s595_s1 = inlined_call_operand.vmem [shape: f32[1,32], index: 1, kind: input, shape index: {}]   ;;  %s596_s2 = inlined_call_operand.<no memory space> [shape: f32[1,1], index: 2, kind: input, shape index: {}]   ;;  %s597_s3 = inlined_call_operand.hbm [shape: f32[1,256], index: 3, kind: output, shape index: {}]  }
   0x1   :  { %v33_v0 = vld [vmem:[%s594_s0 + $0x80] sm:$0xff]  ;;  %v34_v1 = vld [vmem:[%s594_s0 + $0x88] sm:$0xff]  ;;  %vm451_vm1 = vmpackc.low %vm51_vm0, %vm51_vm0 }
   0x2   :  { %v17_v2 = vld [vmem:[%s594_s0] sm:$0xff]  ;;  %v336_v3 = vpack.c.bf16 %v34_v1, %v33_v0  ;;  %v18_v5 = vld [vmem:[%s594_s0 + $0x8] sm:$0xff]  ;;  %v35_v6 = vld [vmem:[%s594_s0 + $0x90] sm:$0xff] }
   0x3   :  { %v339_v7 = vpack.c.bf16 %v18_v5, %v17_v2  ;;  %v36_v8 = vld [vmem:[%s594_s0 + $0x98] sm:$0xff]  ;;  %v19_v10 = vld [vmem:[%s594_s0 + $0x10] sm:$0xff]  ;;  %v37_v12 = vld [vmem:[%s594_s0 + $0xa0] sm:$0xff] }
   0x4   :  { %338 = vmatprep.subr.msk.bf16.mxu0 %vm451_vm1, %v336_v3  ;;  %v342_v9 = vpack.c.bf16 %v36_v8, %v35_v6  ;;  %v20_v11 = vld [vmem:[%s594_s0 + $0x18] sm:$0xff]  ;;  %v38_v13 = vld [vmem:[%s594_s0 + $0xa8] sm:$0xff]  ;;  %v16_v16 = vld [vmem:[%s595_s1] sm:$0x1] }
   0x5   :  { %341 = vmatpush3.bf16.xpose.msk.msra.mxu0 %vm451_vm1, %v339_v7  ;;  %v345_v14 = vpack.c.bf16 %v20_v11, %v19_v10  ;;  %v348_v15 = vpack.c.bf16 %v38_v13, %v37_v12 }
   0x6   :  { %344 = vmatprep.subr.msk.bf16.mxu0 %vm451_vm1, %v342_v9 }
   0x7   :  { %9 = vsyncpa [#allocation4], 0  ;;  %334 = vmatprep.mubr.msk.f32.mxu0 %vm51_vm0, %v16_v16  ;;  %v21_v17 = vld [vmem:[%s594_s0 + $0x20] sm:$0xff]  ;;  %v22_v18 = vld [vmem:[%s594_s0 + $0x28] sm:$0xff]  ;;  %v50_v50 = vstv %s596_s2  ;;  %v418_v63 = vmov 1966171168   ;;  %v238_v1 = vlaneseq }
   0x8   :  { %v39_v19 = vld [vmem:[%s594_s0 + $0xb0] sm:$0xff]  ;;  %v40_v20 = vld [vmem:[%s594_s0 + $0xb8] sm:$0xff]  ;;  %v351_v21 = vpack.c.bf16 %v22_v18, %v21_v17  ;;  %v41_v25 = vld [vmem:[%s594_s0 + $0xc0] sm:$0xff]  ;;  %v236_v0 = vunpack.c.l.s4 %v418_v63 }
   0x9   :  { %v354_v22 = vpack.c.bf16 %v40_v20, %v39_v19  ;;  %v23_v23 = vld [vmem:[%s594_s0 + $0x30] sm:$0xff]  ;;  %v24_v24 = vld [vmem:[%s594_s0 + $0x38] sm:$0xff]  ;;  %v42_v26 = vld [vmem:[%s594_s0 + $0xc8] sm:$0xff]  ;;  %v239_v3 = vshrl.u32 %v238_v1, 7  ;;  %vm252_vm2 = vcmp.lt.s32.totalorder %v238_v1, 256 }
   0xa   :  { %v357_v27 = vpack.c.bf16 %v24_v24, %v23_v23  ;;  %v360_v28 = vpack.c.bf16 %v42_v26, %v41_v25  ;;  %v25_v29 = vld [vmem:[%s594_s0 + $0x40] sm:$0xff]  ;;  %v26_v30 = vld [vmem:[%s594_s0 + $0x48] sm:$0xff]  ;;  %v43_v31 = vld [vmem:[%s594_s0 + $0xd0] sm:$0xff]  ;;  %v237_v2 = vunpack.c.0.s8 %v236_v0 }
   0xb   :  { %v44_v32 = vld [vmem:[%s594_s0 + $0xd8] sm:$0xff]  ;;  %v363_v33 = vpack.c.bf16 %v26_v30, %v25_v29  ;;  %v27_v35 = vld [vmem:[%s594_s0 + $0x50] sm:$0xff]  ;;  %v45_v37 = vld [vmem:[%s594_s0 + $0xe0] sm:$0xff] }
   0xc   :  { %v366_v34 = vpack.c.bf16 %v44_v32, %v43_v31  ;;  %v28_v36 = vld [vmem:[%s594_s0 + $0x58] sm:$0xff]  ;;  %v46_v38 = vld [vmem:[%s594_s0 + $0xe8] sm:$0xff]  ;;  %v29_v41 = vld [vmem:[%s594_s0 + $0x60] sm:$0xff]  ;;  %v240_v5 = vsub.s32 %v237_v2, %v239_v3 }
   0xd   :  { %347 = vmatpush3.bf16.xpose.msk.msra.mxu0 %vm451_vm1, %v345_v14  ;;  %v369_v39 = vpack.c.bf16 %v28_v36, %v27_v35  ;;  %v372_v40 = vpack.c.bf16 %v46_v38, %v45_v37  ;;  %v30_v42 = vld [vmem:[%s594_s0 + $0x68] sm:$0xff]  ;;  %v47_v43 = vld [vmem:[%s594_s0 + $0xf0] sm:$0xff]  ;;  %v48_v44 = vld [vmem:[%s594_s0 + $0xf8] sm:$0xff] }
   0xe   :  { %350 = vmatprep.subr.msk.bf16.mxu0 %vm451_vm1, %v348_v15  ;;  %v375_v45 = vpack.c.bf16 %v30_v42, %v29_v41  ;;  %v378_v46 = vpack.c.bf16 %v48_v44, %v47_v43  ;;  %v31_v47 = vld [vmem:[%s594_s0 + $0x70] sm:$0xff]  ;;  %v32_v48 = vld [vmem:[%s594_s0 + $0x78] sm:$0xff]  ;;  %s419_s0 = smov [#allocation3]  }
   0xf   :  { %v381_v49 = vpack.c.bf16 %v32_v48, %v31_v47  ;;  %s261_s2 = sshll.u32 %s419_s0, 4  ;;  %s262_s2 = int_to_ptr.vmem [resolvable:$true] %s261_s2 }
  0x10   :  { %s394_s24 = scalar_lea.vmem %s262_s2, 32  ;;  %p399_p1 = scmp.lt.s32.totalorder %s262_s2, %s262_s2 }
  0x11   :  { %p395_p0 = scmp.ne.s32.totalorder %s262_s2, %s394_s24  ;;  %p400_p2 = scmp.lt.s32.totalorder %s394_s24, %s394_s24 }
  0x13   :  { %p401_p3 = por %p400_p2, %p399_p1 }
  0x15   :  { %353 = vmatpush3.bf16.xpose.msk.msra.mxu0 %vm451_vm1, %v351_v21  ;;  %p402_p4 = pnand %p401_p3, %p395_p0 }
  0x16   :  { %356 = vmatprep.subr.msk.bf16.mxu0 %vm451_vm1, %v354_v22 }
  0x1d   :  { %359 = vmatpush3.bf16.xpose.msk.msra.mxu0 %vm451_vm1, %v357_v27 }
  0x1e   :  { %362 = vmatprep.subr.msk.bf16.mxu0 %vm451_vm1, %v360_v28 }
  0x25   :  { %365 = vmatpush3.bf16.xpose.msk.msra.mxu0 %vm451_vm1, %v363_v33 }
  0x26   :  { %368 = vmatprep.subr.msk.bf16.mxu0 %vm451_vm1, %v366_v34 }
  0x2d   :  { %371 = vmatpush3.bf16.xpose.msk.msra.mxu0 %vm451_vm1, %v369_v39 }
  0x2e   :  { %374 = vmatprep.subr.msk.bf16.mxu0 %vm451_vm1, %v372_v40 }
  0x35   :  { %377 = vmatpush3.bf16.xpose.msk.msra.mxu0 %vm451_vm1, %v375_v45 }
  0x36   :  { %380 = vmatprep.subr.msk.bf16.mxu0 %vm451_vm1, %v378_v46 }
  0x3d   :  { %383 = vmatpush3.bf16.xpose.msk.msra.mxu0 %vm451_vm1, %v381_v49 }
  0x44   :  { %335 = vmatmul.mubr.msk.f32.vlgmr.msra.gmra.mrb[0].mxu0 %vm51_vm0, %v16_v16 }
 0x117   :  { %v217_v51 = vpop.f32.mrb[0].mxu0 }
 0x118   :  { %v218_v52 = vadd.f32 %v217_v51, %v50_v50  ;;  %v219_v53 = vpop.f32.mrb[1].mxu0 }
 0x119   :  { %v220_v54 = vadd.f32 %v219_v53, %v50_v50 }
 0x11a   :  { %v222_v55 = vsub.f32 0.0, %v218_v52 }
 0x11b   :  { %v223_v56 = vsub.f32 0.0, %v220_v54 }
 0x11c   :  { %v224_v57 = vmul.f32 1.442695, %v222_v55 }
 0x11d   :  { %v226_v58 = vmul.f32 1.442695, %v223_v56 }
 0x11e   :  { %386 = vpow2.f32 %v224_v57 }
 0x11f   :  { %388 = vpow2.f32 %v226_v58 }
 0x128   :  { %v387_v59 = vpop.eup %386 }
 0x129   :  { %v389_v60 = vpop.eup %388  ;;  %v228_v61 = vadd.f32 1.0, %v387_v59 }
 0x12a   :  { %v229_v62 = vadd.f32 1.0, %v389_v60 }
 0x12b   :  { %390 = vrcp.f32 %v228_v61 }
 0x12c   :  { %392 = vrcp.f32 %v229_v62 }
 0x135   :  { %v391_v4 = vpop.eup %390 }
 0x136   :  { %v393_v6 = vpop.eup %392 }
 0x137   :  { %v234_v7 = vcombine.low %v391_v4, %v393_v6 }
 0x139   :  { %v241_v8 = vrot.slane %v234_v7, %v240_v5 }
 0x13b   :  { %v248_v9 = vrot.slane %v241_v8, %v240_v5 }
 0x13d   :  { %254 = vst.msk [vmem:[#allocation3] sm:$0x3] %vm252_vm2, %v248_v9 }
 0x13e   :  { %405 = shalt.err (!%p402_p4)
}
 0x13f   :  { %s406_s27 = scalar_lea.hbm %s597_s3, 32 }
 0x140   :  { %p407_p5 = scmp.ne.s32.totalorder %s597_s3, %s406_s27  ;;  %p410_p6 = scmp.lt.u32.totalorder %s406_s27, %s597_s3 }
 0x142   :  { %p412_p7 = pnand %p410_p6, %p407_p5 }
 0x144   :  { %415 = shalt.err (!%p412_p7)
}
 0x145   :  { %264 = dma.vmem_to_hbm [thread:$0]  %s262_s2, 32, %s597_s3, [#allocation4]  }
 0x146   :  { %416 = dma.done.wait [#allocation4], 32  }
 0x147   :  { %417 = vsyncadd [#allocation4], 4294967264 }
 0x148   :  { %268 = vsyncpa [#allocation4], 1 }

</bundles_post_ra>
